<compile_context>
chip_gen: v6e
topology: v6e:2x2x1
jax: 0.10.0
libtpu: 0.0.40
codegen_flags: <defaults>
</compile_context>

<pallas_src>
import functools

import jax
import jax.numpy as jnp
from jax.experimental import pallas as pl
from jax.experimental.pallas import tpu as pltpu

INPUT_SIZE = 2
HIDDEN_SIZE = 6
OUTPUT_SIZE = 1

_LANE = 128                      # vreg lane width
_SUBLANE = 8                     # vreg sublane count
_MIN_TILE = _LANE * _SUBLANE     # 1024 rows = one fully dense f32 vreg


def _cdiv(a, b):
    return -(-a // b)


def _sigmoid(z):
    # One EUP op (tanh) instead of exp + f32 divide; mathematically identical.
    return 0.5 * (jnp.tanh(0.5 * z) + 1.0)


def _mlp_kernel(x_ref, w1_ref, b1_ref, w2_ref, b2_ref, o_ref):
    """x_ref: (K, TR, 128) VMEM; w1/b1/w2/b2 whole in SMEM; o_ref: (TR, 128) VMEM.

    Batch occupies the (sublane-rows x 128 lanes) slab, so all arithmetic runs
    at full vreg occupancy.  The 2->6->1 contraction is fully unrolled into
    VPU scalar*slab FMAs + EUP tanh; no MXU, no in-kernel transposes.
    """
    H, K = w1_ref.shape            # (6, 2)

    # Hoist all SMEM scalar reads and the K feature slabs once.
    xs = [x_ref[k] for k in range(K)]                               # (TR, 128) each
    w1 = [[w1_ref[h, k] for k in range(K)] for h in range(H)]
    b1 = [b1_ref[h] for h in range(H)]
    w2 = [w2_ref[0, h] for h in range(H)]
    b2 = b2_ref[0]

    z2 = None
    for h in range(H):
        z1 = xs[0] * w1[h][0]
        for k in range(1, K):
            z1 = z1 + xs[k] * w1[h][k]
        z1 = z1 + b1[h]
        a1 = _sigmoid(z1)
        contrib = a1 * w2[h]
        z2 = contrib if z2 is None else z2 + contrib
    z2 = z2 + b2
    o_ref[...] = _sigmoid(z2).astype(o_ref.dtype)


def mlp_forward(x, w1, b1, w2, b2, *, batch_tile=256 * 1024):
    """x: (B, K); w1: (H, K); b1: (H,); w2: (O, H); b2: (O,) — PyTorch Linear layout."""
    B, K = x.shape
    O = w2.shape[0]
    assert O == 1, "lane-dense output layout assumes a single output unit"

    # Tile rows per grid step: a multiple of 1024 (8 sublanes x 128 lanes).
    tb = max(_MIN_TILE, (batch_tile // _MIN_TILE) * _MIN_TILE)
    tb = min(tb, _cdiv(B, _MIN_TILE) * _MIN_TILE)
    Bp = _cdiv(B, tb) * tb
    # Prefer >= 2 grid steps so the "parallel" axis can shard across both v7x
    # TensorCores (and DMA overlaps compute everywhere).
    if Bp // tb < 2 and tb > _MIN_TILE:
        tb = max(_MIN_TILE, (tb // 2 // _MIN_TILE) * _MIN_TILE)
        Bp = _cdiv(B, tb) * tb

    rows = Bp // _LANE             # total sublane-rows
    tr = tb // _LANE               # sublane-rows per grid step (multiple of 8)

    # Lane-densify: batch index b -> (row b // 128, lane b % 128).
    # K == 2, so this wrapper-side transpose/reshape is a cheap one-off.
    xt = jnp.pad(x, ((0, Bp - B), (0, 0))).T.reshape(K, rows, _LANE)

    smem = functools.partial(pl.BlockSpec, memory_space=pltpu.MemorySpace.SMEM)
    out2d = pl.pallas_call(
        _mlp_kernel,
        out_shape=jax.ShapeDtypeStruct((rows, _LANE), jnp.float32),
        grid=(rows // tr,),
        in_specs=[
            pl.BlockSpec((K, tr, _LANE), lambda i: (0, i, 0)),  # activations (VMEM)
            smem(), smem(), smem(), smem(),                     # params resident in SMEM
        ],
        out_specs=pl.BlockSpec((tr, _LANE), lambda i: (i, 0)),
        compiler_params=pltpu.CompilerParams(
            dimension_semantics=("parallel",),   # v7x: shard batch over both TCs
        ),
    )(xt, w1, b1, w2, b2)

    # (rows, 128) -> (Bp, 1) is a free contiguous reshape; drop the padding.
    return out2d.reshape(Bp, 1)[:B]


def reference_forward(x, w1, b1, w2, b2):
    a1 = jax.nn.sigmoid(x @ w1.T + b1)
    return jax.nn.sigmoid(a1 @ w2.T + b2)


if __name__ == "__main__":
    key = jax.random.PRNGKey(0)
    k_x, k_w1, k_w2 = jax.random.split(key, 3)

    # Deterministic parameter init mirroring the module's __init__:
    #   weights ~ N(0, 1), biases = 0
    w1 = jax.random.normal(k_w1, (HIDDEN_SIZE, INPUT_SIZE), dtype=jnp.float32)
    b1 = jnp.zeros((HIDDEN_SIZE,), dtype=jnp.float32)
    w2 = jax.random.normal(k_w2, (OUTPUT_SIZE, HIDDEN_SIZE), dtype=jnp.float32)
    b2 = jnp.zeros((OUTPUT_SIZE,), dtype=jnp.float32)

    # Small primary check (module-sized batch).
    batch = 8
    x = jax.random.normal(k_x, (batch, INPUT_SIZE), dtype=jnp.float32)
    out = jax.block_until_ready(mlp_forward(x, w1, b1, w2, b2))
    ref = reference_forward(x, w1, b1, w2, b2)
    assert out.shape == (batch, OUTPUT_SIZE), out.shape
    assert jnp.allclose(out, ref, atol=1e-5, rtol=1e-5), (out, ref)

    # Secondary check: exercises batch padding and a multi-step grid.
    batch2 = 5000
    x2 = jax.random.normal(k_x, (batch2, INPUT_SIZE), dtype=jnp.float32)
    out2 = jax.block_until_ready(mlp_forward(x2, w1, b1, w2, b2, batch_tile=2048))
    ref2 = reference_forward(x2, w1, b1, w2, b2)
    assert out2.shape == (batch2, OUTPUT_SIZE), out2.shape
    assert jnp.allclose(out2, ref2, atol=1e-5, rtol=1e-5)

    print("KERNEL_OK")
</pallas_src>

<mosaic_0001>
module attributes {stable_mosaic.version = 11 : i64} {
  func.func @_mlp_kernel(%arg0: i32, %arg1: memref<2x8x128xf32, #tpu.memory_space<vmem>>, %arg2: memref<6x2xf32, #tpu.memory_space<smem>>, %arg3: memref<6xf32, #tpu.memory_space<smem>>, %arg4: memref<1x6xf32, #tpu.memory_space<smem>>, %arg5: memref<1xf32, #tpu.memory_space<smem>>, %arg6: memref<8x128xf32, #tpu.memory_space<vmem>>) attributes {dimension_semantics = [#tpu.dimension_semantics<parallel>], iteration_bounds = array<i64: 1>, scalar_prefetch = 0 : i64, scratch_operands = 0 : i64, tpu.core_type = #tpu.core_type<tc>, window_params = [{transform_indices = @transform_0, window_bounds = array<i64: 2, 8, 128>}, {transform_indices = @transform_1, window_bounds = array<i64: 6, 2>}, {transform_indices = @transform_2, window_bounds = array<i64: 6>}, {transform_indices = @transform_3, window_bounds = array<i64: 1, 6>}, {transform_indices = @transform_4, window_bounds = array<i64: 1>}, {transform_indices = @transform_5, window_bounds = array<i64: 8, 128>}]} {
    %c0 = arith.constant 0 : index
    %c0_0 = arith.constant 0 : index
    %c0_1 = arith.constant 0 : index
    %0 = vector.load %arg1[%c0, %c0_0, %c0_1] : memref<2x8x128xf32, #tpu.memory_space<vmem>>, vector<1x8x128xf32>
    %1 = vector.shape_cast %0 : vector<1x8x128xf32> to vector<8x128xf32>
    %c1 = arith.constant 1 : index
    %c0_2 = arith.constant 0 : index
    %c0_3 = arith.constant 0 : index
    %2 = vector.load %arg1[%c1, %c0_2, %c0_3] : memref<2x8x128xf32, #tpu.memory_space<vmem>>, vector<1x8x128xf32>
    %3 = vector.shape_cast %2 : vector<1x8x128xf32> to vector<8x128xf32>
    %c0_4 = arith.constant 0 : index
    %c0_5 = arith.constant 0 : index
    %4 = memref.load %arg2[%c0_4, %c0_5] : memref<6x2xf32, #tpu.memory_space<smem>>
    %c0_6 = arith.constant 0 : index
    %c1_7 = arith.constant 1 : index
    %5 = memref.load %arg2[%c0_6, %c1_7] : memref<6x2xf32, #tpu.memory_space<smem>>
    %c1_8 = arith.constant 1 : index
    %c0_9 = arith.constant 0 : index
    %6 = memref.load %arg2[%c1_8, %c0_9] : memref<6x2xf32, #tpu.memory_space<smem>>
    %c1_10 = arith.constant 1 : index
    %c1_11 = arith.constant 1 : index
    %7 = memref.load %arg2[%c1_10, %c1_11] : memref<6x2xf32, #tpu.memory_space<smem>>
    %c2 = arith.constant 2 : index
    %c0_12 = arith.constant 0 : index
    %8 = memref.load %arg2[%c2, %c0_12] : memref<6x2xf32, #tpu.memory_space<smem>>
    %c2_13 = arith.constant 2 : index
    %c1_14 = arith.constant 1 : index
    %9 = memref.load %arg2[%c2_13, %c1_14] : memref<6x2xf32, #tpu.memory_space<smem>>
    %c3 = arith.constant 3 : index
    %c0_15 = arith.constant 0 : index
    %10 = memref.load %arg2[%c3, %c0_15] : memref<6x2xf32, #tpu.memory_space<smem>>
    %c3_16 = arith.constant 3 : index
    %c1_17 = arith.constant 1 : index
    %11 = memref.load %arg2[%c3_16, %c1_17] : memref<6x2xf32, #tpu.memory_space<smem>>
    %c4 = arith.constant 4 : index
    %c0_18 = arith.constant 0 : index
    %12 = memref.load %arg2[%c4, %c0_18] : memref<6x2xf32, #tpu.memory_space<smem>>
    %c4_19 = arith.constant 4 : index
    %c1_20 = arith.constant 1 : index
    %13 = memref.load %arg2[%c4_19, %c1_20] : memref<6x2xf32, #tpu.memory_space<smem>>
    %c5 = arith.constant 5 : index
    %c0_21 = arith.constant 0 : index
    %14 = memref.load %arg2[%c5, %c0_21] : memref<6x2xf32, #tpu.memory_space<smem>>
    %c5_22 = arith.constant 5 : index
    %c1_23 = arith.constant 1 : index
    %15 = memref.load %arg2[%c5_22, %c1_23] : memref<6x2xf32, #tpu.memory_space<smem>>
    %c0_24 = arith.constant 0 : index
    %16 = memref.load %arg3[%c0_24] : memref<6xf32, #tpu.memory_space<smem>>
    %c1_25 = arith.constant 1 : index
    %17 = memref.load %arg3[%c1_25] : memref<6xf32, #tpu.memory_space<smem>>
    %c2_26 = arith.constant 2 : index
    %18 = memref.load %arg3[%c2_26] : memref<6xf32, #tpu.memory_space<smem>>
    %c3_27 = arith.constant 3 : index
    %19 = memref.load %arg3[%c3_27] : memref<6xf32, #tpu.memory_space<smem>>
    %c4_28 = arith.constant 4 : index
    %20 = memref.load %arg3[%c4_28] : memref<6xf32, #tpu.memory_space<smem>>
    %c5_29 = arith.constant 5 : index
    %21 = memref.load %arg3[%c5_29] : memref<6xf32, #tpu.memory_space<smem>>
    %c0_30 = arith.constant 0 : index
    %c0_31 = arith.constant 0 : index
    %22 = memref.load %arg4[%c0_30, %c0_31] : memref<1x6xf32, #tpu.memory_space<smem>>
    %c0_32 = arith.constant 0 : index
    %c1_33 = arith.constant 1 : index
    %23 = memref.load %arg4[%c0_32, %c1_33] : memref<1x6xf32, #tpu.memory_space<smem>>
    %c0_34 = arith.constant 0 : index
    %c2_35 = arith.constant 2 : index
    %24 = memref.load %arg4[%c0_34, %c2_35] : memref<1x6xf32, #tpu.memory_space<smem>>
    %c0_36 = arith.constant 0 : index
    %c3_37 = arith.constant 3 : index
    %25 = memref.load %arg4[%c0_36, %c3_37] : memref<1x6xf32, #tpu.memory_space<smem>>
    %c0_38 = arith.constant 0 : index
    %c4_39 = arith.constant 4 : index
    %26 = memref.load %arg4[%c0_38, %c4_39] : memref<1x6xf32, #tpu.memory_space<smem>>
    %c0_40 = arith.constant 0 : index
    %c5_41 = arith.constant 5 : index
    %27 = memref.load %arg4[%c0_40, %c5_41] : memref<1x6xf32, #tpu.memory_space<smem>>
    %c0_42 = arith.constant 0 : index
    %28 = memref.load %arg5[%c0_42] : memref<1xf32, #tpu.memory_space<smem>>
    %29 = vector.broadcast %4 : f32 to vector<8x128xf32>
    %30 = arith.mulf %1, %29 : vector<8x128xf32>
    %31 = vector.broadcast %5 : f32 to vector<8x128xf32>
    %32 = arith.mulf %3, %31 : vector<8x128xf32>
    %33 = arith.addf %30, %32 : vector<8x128xf32>
    %34 = vector.broadcast %16 : f32 to vector<8x128xf32>
    %35 = arith.addf %33, %34 : vector<8x128xf32>
    %cst = arith.constant 5.000000e-01 : f32
    %36 = vector.broadcast %cst : f32 to vector<8x128xf32>
    %37 = arith.mulf %36, %35 : vector<8x128xf32>
    %38 = math.tanh %37 : vector<8x128xf32>
    %cst_43 = arith.constant 1.000000e+00 : f32
    %39 = vector.broadcast %cst_43 : f32 to vector<8x128xf32>
    %40 = arith.addf %38, %39 : vector<8x128xf32>
    %cst_44 = arith.constant 5.000000e-01 : f32
    %41 = vector.broadcast %cst_44 : f32 to vector<8x128xf32>
    %42 = arith.mulf %41, %40 : vector<8x128xf32>
    %43 = vector.broadcast %22 : f32 to vector<8x128xf32>
    %44 = arith.mulf %42, %43 : vector<8x128xf32>
    %45 = vector.broadcast %6 : f32 to vector<8x128xf32>
    %46 = arith.mulf %1, %45 : vector<8x128xf32>
    %47 = vector.broadcast %7 : f32 to vector<8x128xf32>
    %48 = arith.mulf %3, %47 : vector<8x128xf32>
    %49 = arith.addf %46, %48 : vector<8x128xf32>
    %50 = vector.broadcast %17 : f32 to vector<8x128xf32>
    %51 = arith.addf %49, %50 : vector<8x128xf32>
    %cst_45 = arith.constant 5.000000e-01 : f32
    %52 = vector.broadcast %cst_45 : f32 to vector<8x128xf32>
    %53 = arith.mulf %52, %51 : vector<8x128xf32>
    %54 = math.tanh %53 : vector<8x128xf32>
    %cst_46 = arith.constant 1.000000e+00 : f32
    %55 = vector.broadcast %cst_46 : f32 to vector<8x128xf32>
    %56 = arith.addf %54, %55 : vector<8x128xf32>
    %cst_47 = arith.constant 5.000000e-01 : f32
    %57 = vector.broadcast %cst_47 : f32 to vector<8x128xf32>
    %58 = arith.mulf %57, %56 : vector<8x128xf32>
    %59 = vector.broadcast %23 : f32 to vector<8x128xf32>
    %60 = arith.mulf %58, %59 : vector<8x128xf32>
    %61 = arith.addf %44, %60 : vector<8x128xf32>
    %62 = vector.broadcast %8 : f32 to vector<8x128xf32>
    %63 = arith.mulf %1, %62 : vector<8x128xf32>
    %64 = vector.broadcast %9 : f32 to vector<8x128xf32>
    %65 = arith.mulf %3, %64 : vector<8x128xf32>
    %66 = arith.addf %63, %65 : vector<8x128xf32>
    %67 = vector.broadcast %18 : f32 to vector<8x128xf32>
    %68 = arith.addf %66, %67 : vector<8x128xf32>
    %cst_48 = arith.constant 5.000000e-01 : f32
    %69 = vector.broadcast %cst_48 : f32 to vector<8x128xf32>
    %70 = arith.mulf %69, %68 : vector<8x128xf32>
    %71 = math.tanh %70 : vector<8x128xf32>
    %cst_49 = arith.constant 1.000000e+00 : f32
    %72 = vector.broadcast %cst_49 : f32 to vector<8x128xf32>
    %73 = arith.addf %71, %72 : vector<8x128xf32>
    %cst_50 = arith.constant 5.000000e-01 : f32
    %74 = vector.broadcast %cst_50 : f32 to vector<8x128xf32>
    %75 = arith.mulf %74, %73 : vector<8x128xf32>
    %76 = vector.broadcast %24 : f32 to vector<8x128xf32>
    %77 = arith.mulf %75, %76 : vector<8x128xf32>
    %78 = arith.addf %61, %77 : vector<8x128xf32>
    %79 = vector.broadcast %10 : f32 to vector<8x128xf32>
    %80 = arith.mulf %1, %79 : vector<8x128xf32>
    %81 = vector.broadcast %11 : f32 to vector<8x128xf32>
    %82 = arith.mulf %3, %81 : vector<8x128xf32>
    %83 = arith.addf %80, %82 : vector<8x128xf32>
    %84 = vector.broadcast %19 : f32 to vector<8x128xf32>
    %85 = arith.addf %83, %84 : vector<8x128xf32>
    %cst_51 = arith.constant 5.000000e-01 : f32
    %86 = vector.broadcast %cst_51 : f32 to vector<8x128xf32>
    %87 = arith.mulf %86, %85 : vector<8x128xf32>
    %88 = math.tanh %87 : vector<8x128xf32>
    %cst_52 = arith.constant 1.000000e+00 : f32
    %89 = vector.broadcast %cst_52 : f32 to vector<8x128xf32>
    %90 = arith.addf %88, %89 : vector<8x128xf32>
    %cst_53 = arith.constant 5.000000e-01 : f32
    %91 = vector.broadcast %cst_53 : f32 to vector<8x128xf32>
    %92 = arith.mulf %91, %90 : vector<8x128xf32>
    %93 = vector.broadcast %25 : f32 to vector<8x128xf32>
    %94 = arith.mulf %92, %93 : vector<8x128xf32>
    %95 = arith.addf %78, %94 : vector<8x128xf32>
    %96 = vector.broadcast %12 : f32 to vector<8x128xf32>
    %97 = arith.mulf %1, %96 : vector<8x128xf32>
    %98 = vector.broadcast %13 : f32 to vector<8x128xf32>
    %99 = arith.mulf %3, %98 : vector<8x128xf32>
    %100 = arith.addf %97, %99 : vector<8x128xf32>
    %101 = vector.broadcast %20 : f32 to vector<8x128xf32>
    %102 = arith.addf %100, %101 : vector<8x128xf32>
    %cst_54 = arith.constant 5.000000e-01 : f32
    %103 = vector.broadcast %cst_54 : f32 to vector<8x128xf32>
    %104 = arith.mulf %103, %102 : vector<8x128xf32>
    %105 = math.tanh %104 : vector<8x128xf32>
    %cst_55 = arith.constant 1.000000e+00 : f32
    %106 = vector.broadcast %cst_55 : f32 to vector<8x128xf32>
    %107 = arith.addf %105, %106 : vector<8x128xf32>
    %cst_56 = arith.constant 5.000000e-01 : f32
    %108 = vector.broadcast %cst_56 : f32 to vector<8x128xf32>
    %109 = arith.mulf %108, %107 : vector<8x128xf32>
    %110 = vector.broadcast %26 : f32 to vector<8x128xf32>
    %111 = arith.mulf %109, %110 : vector<8x128xf32>
    %112 = arith.addf %95, %111 : vector<8x128xf32>
    %113 = vector.broadcast %14 : f32 to vector<8x128xf32>
    %114 = arith.mulf %1, %113 : vector<8x128xf32>
    %115 = vector.broadcast %15 : f32 to vector<8x128xf32>
    %116 = arith.mulf %3, %115 : vector<8x128xf32>
    %117 = arith.addf %114, %116 : vector<8x128xf32>
    %118 = vector.broadcast %21 : f32 to vector<8x128xf32>
    %119 = arith.addf %117, %118 : vector<8x128xf32>
    %cst_57 = arith.constant 5.000000e-01 : f32
    %120 = vector.broadcast %cst_57 : f32 to vector<8x128xf32>
    %121 = arith.mulf %120, %119 : vector<8x128xf32>
    %122 = math.tanh %121 : vector<8x128xf32>
    %cst_58 = arith.constant 1.000000e+00 : f32
    %123 = vector.broadcast %cst_58 : f32 to vector<8x128xf32>
    %124 = arith.addf %122, %123 : vector<8x128xf32>
    %cst_59 = arith.constant 5.000000e-01 : f32
    %125 = vector.broadcast %cst_59 : f32 to vector<8x128xf32>
    %126 = arith.mulf %125, %124 : vector<8x128xf32>
    %127 = vector.broadcast %27 : f32 to vector<8x128xf32>
    %128 = arith.mulf %126, %127 : vector<8x128xf32>
    %129 = arith.addf %112, %128 : vector<8x128xf32>
    %130 = vector.broadcast %28 : f32 to vector<8x128xf32>
    %131 = arith.addf %129, %130 : vector<8x128xf32>
    %cst_60 = arith.constant 5.000000e-01 : f32
    %132 = vector.broadcast %cst_60 : f32 to vector<8x128xf32>
    %133 = arith.mulf %132, %131 : vector<8x128xf32>
    %134 = math.tanh %133 : vector<8x128xf32>
    %cst_61 = arith.constant 1.000000e+00 : f32
    %135 = vector.broadcast %cst_61 : f32 to vector<8x128xf32>
    %136 = arith.addf %134, %135 : vector<8x128xf32>
    %cst_62 = arith.constant 5.000000e-01 : f32
    %137 = vector.broadcast %cst_62 : f32 to vector<8x128xf32>
    %138 = arith.mulf %137, %136 : vector<8x128xf32>
    %c0_63 = arith.constant 0 : index
    %c0_64 = arith.constant 0 : index
    %139 = vector.load %arg6[%c0_63, %c0_64] : memref<8x128xf32, #tpu.memory_space<vmem>>, vector<8x128xf32>
    tpu.vector_store %arg6[%c0_63, %c0_64], %138 {strides = array<i32>} : memref<8x128xf32, #tpu.memory_space<vmem>>, vector<8x128xf32>,
    return
  }
  func.func @transform_0(%arg0: i32) -> (i32, i32, i32) {
    %c0_i32 = arith.constant 0 : i32
    %c0_i32_0 = arith.constant 0 : i32
    %c0_i32_1 = arith.constant 0 : i32
    return %c0_i32, %arg0, %c0_i32_0 : i32, i32, i32
  }
  func.func @transform_1(%arg0: i32) -> (i32, i32) {
    %c0_i32 = arith.constant 0 : i32
    %c0_i32_0 = arith.constant 0 : i32
    %c0_i32_1 = arith.constant 0 : i32
    return %c0_i32, %c0_i32_0 : i32, i32
  }
  func.func @transform_2(%arg0: i32) -> i32 {
    %c0_i32 = arith.constant 0 : i32
    %c0_i32_0 = arith.constant 0 : i32
    return %c0_i32 : i32
  }
  func.func @transform_3(%arg0: i32) -> (i32, i32) {
    %c0_i32 = arith.constant 0 : i32
    %c0_i32_0 = arith.constant 0 : i32
    %c0_i32_1 = arith.constant 0 : i32
    return %c0_i32, %c0_i32_0 : i32, i32
  }
  func.func @transform_4(%arg0: i32) -> i32 {
    %c0_i32 = arith.constant 0 : i32
    %c0_i32_0 = arith.constant 0 : i32
    return %c0_i32 : i32
  }
  func.func @transform_5(%arg0: i32) -> (i32, i32) {
    %c0_i32 = arith.constant 0 : i32
    %c0_i32_0 = arith.constant 0 : i32
    return %arg0, %c0_i32 : i32, i32
  }
}

</mosaic_0001>

<bundles_post_ra>
// kernel: tpu_custom_call.1
= control target key start
LH: loop header
LB: loop body
LE: loop exit
PB: predicated region body
PF: predicated region fallthrough
CT: control target
= control target key end

     0   :  { %11 = vsyncpa [#allocation4], 0  ;;  %s394_s0 = inlined_call_operand.hbm [shape: f32[2,8,128], index: 0, kind: input, shape index: {}]   ;;  %s395_s1 = inlined_call_operand.vmem [shape: f32[6,2], index: 1, kind: input, shape index: {}]   ;;  %s396_s2 = inlined_call_operand.vmem [shape: f32[6], index: 2, kind: input, shape index: {}]   ;;  %s397_s3 = inlined_call_operand.vmem [shape: f32[1,6], index: 3, kind: input, shape index: {}]   ;;  %s398_s4 = inlined_call_operand.<no memory space> [shape: f32[1], index: 4, kind: input, shape index: {}]   ;;  %s399_s5 = inlined_call_operand.hbm [shape: f32[8,128], index: 5, kind: output, shape index: {}]  }
   0x1   :  { %12 = vsyncpa [#allocation6], 0 }
   0x2   :  { %13 = vsyncpa [#allocation9], 0  ;;  %s43_s20 = sshll.u32 %s396_s2, 4  ;;  %s44_s20 = int_to_ptr.vmem [resolvable:$true] %s43_s20 }
   0x3   :  { %14 = vsyncpa [#allocation5], 0  ;;  %s249_s21 = scalar_lea.vmem %s44_s20, 16  ;;  %p254_p1 = scmp.lt.s32.totalorder %s44_s20, %s44_s20 }
   0x4   :  { %p250_p0 = scmp.ne.s32.totalorder %s44_s20, %s249_s21  ;;  %p255_p2 = scmp.lt.s32.totalorder %s249_s21, %s249_s21 }
   0x6   :  { %p256_p3 = por %p255_p2, %p254_p1 }
   0x8   :  { %p257_p4 = pnand %p256_p3, %p250_p0 }
   0xa   :  { %260 = shalt.err (!%p257_p4)
}
   0xb   :  { %s333_s22 = smov [#allocation8]   ;;  %s334_s23 = smov [#allocation3]  }
   0xc   :  { %46 = dma.vmem_to_smem %s44_s20, 16, %s333_s22, [#allocation9]  }
   0xd   :  { %s20_s24 = sshll.u32 %s334_s23, 4  ;;  %s21_s24 = int_to_ptr.vmem [resolvable:$true] %s20_s24 }
   0xe   :  { %s269_s25 = scalar_lea.vmem %s21_s24, 256  ;;  %p274_p6 = scmp.lt.s32.totalorder %s21_s24, %s21_s24 }
   0xf   :  { %p270_p5 = scmp.ne.s32.totalorder %s21_s24, %s269_s25  ;;  %p275_p7 = scmp.lt.s32.totalorder %s269_s25, %s269_s25 }
  0x11   :  { %p276_p8 = por %p275_p7, %p274_p6 }
  0x13   :  { %p277_p9 = pnand %p276_p8, %p270_p5 }
  0x15   :  { %280 = shalt.err (!%p277_p9)
}
  0x16   :  { %s335_s2 = smov 128   ;;  %s336_s26 = smov 8  }
  0x17   :  { %26 = dma.hbm_to_vmem [thread:$0]  %s394_s0, 256, %s21_s24, [#allocation4], %s335_s2, %s335_s2, %s336_s26  }
  0x18   :  { %s33_s6 = sshll.u32 %s395_s1, 4  ;;  %s53_s9 = sshll.u32 %s397_s3, 4  ;;  %s34_s6 = int_to_ptr.vmem [resolvable:$true] %s33_s6  ;;  %s54_s9 = int_to_ptr.vmem [resolvable:$true] %s53_s9 }
  0x19   :  { %s281_s10 = scalar_lea.vmem %s34_s6, 128  ;;  %p286_p11 = scmp.lt.s32.totalorder %s34_s6, %s34_s6 }
  0x1a   :  { %p282_p10 = scmp.ne.s32.totalorder %s34_s6, %s281_s10  ;;  %p287_p12 = scmp.lt.s32.totalorder %s281_s10, %s281_s10 }
  0x1c   :  { %p288_p13 = por %p287_p12, %p286_p11 }
  0x1e   :  { %p289_p0 = pnand %p288_p13, %p282_p10 }
  0x20   :  { %292 = shalt.err (!%p289_p0)
}
  0x21   :  { %s337_s11 = smov [#allocation7]   ;;  %s293_s0 = scalar_lea.vmem %s54_s9, 16 }
  0x22   :  { %36 = dma.vmem_to_smem %s34_s6, 128, %s337_s11, [#allocation6]  }
  0x23   :  { %p294_p1 = scmp.ne.s32.totalorder %s54_s9, %s293_s0  ;;  %p298_p2 = scmp.lt.s32.totalorder %s54_s9, %s54_s9 }
  0x24   :  { %p299_p3 = scmp.lt.s32.totalorder %s293_s0, %s293_s0 }
  0x26   :  { %p300_p4 = por %p299_p3, %p298_p2 }
  0x28   :  { %p301_p5 = pnand %p300_p4, %p294_p1 }
  0x2a   :  { %304 = shalt.err (!%p301_p5)
}
  0x2b   :  { %s338_s1 = smov [#allocation10]  }
  0x2c   :  { %56 = dma.vmem_to_smem %s54_s9, 16, %s338_s1, [#allocation9]  }
  0x2d   :  { %325 = dma.done.wait [#allocation4], 256  }
  0x2e   :  { %326 = vsyncadd [#allocation4], 4294967040 }
  0x2f   :  { %327 = dma.done.wait [#allocation6], 128  }
  0x30   :  { %328 = vsyncadd [#allocation6], 4294967168 }
  0x31   :  { %329 = dma.done.wait [#allocation9], 32  }
  0x32   :  { %330 = vsyncadd [#allocation9], 4294967264 }
  0x33   :  { %71 = sfence }
  0x34   :  { %s75_s3 = sld [smem:[#allocation7]]  ;;  %v72_v0 = vld [vmem:[#allocation3] sm:$0xff]  ;;  %v74_v1 = vld [vmem:[#allocation3 + $0x8] sm:$0xff]  ;;  %s339_s11 = smov [#allocation11]  }
  0x35   :  { %s207_s12 = sld [smem:[#allocation7 + $0x1]]  ;;  %s196_s0 = sshll.u32 %s339_s11, 4  ;;  %s197_s0 = int_to_ptr.vmem [resolvable:$true] %s196_s0 }
  0x36   :  { %s208_s13 = sld [smem:[#allocation7 + $0x80]]  ;;  %s305_s1 = scalar_lea.vmem %s197_s0, 128 }
  0x37   :  { %s209_s14 = sld [smem:[#allocation7 + $0x81]]  ;;  %p306_p6 = scmp.ne.s32.totalorder %s197_s0, %s305_s1 }
  0x38   :  { %s210_s15 = sld [smem:[#allocation7 + $0x100]]  ;;  %p310_p7 = scmp.lt.s32.totalorder %s197_s0, %s197_s0 }
  0x39   :  { %s211_s16 = sld [smem:[#allocation7 + $0x101]]  ;;  %p311_p8 = scmp.lt.s32.totalorder %s305_s1, %s305_s1 }
  0x3a   :  { %s212_s17 = sld [smem:[#allocation7 + $0x180]]  ;;  %v100_v2 = vstv %s75_s3 }
  0x3b   :  { %s213_s18 = sld [smem:[#allocation7 + $0x181]]  ;;  %v102_v3 = vstv %s207_s12  ;;  %v101_v7 = vmul.f32 %v100_v2, %v72_v0  ;;  %p312_p9 = por %p311_p8, %p310_p7 }
  0x3c   :  { %s214_s19 = sld [smem:[#allocation7 + $0x200]]  ;;  %v113_v4 = vstv %s208_s13  ;;  %v103_v8 = vmul.f32 %v102_v3, %v74_v1 }
  0x3d   :  { %s215_s20 = sld [smem:[#allocation7 + $0x201]]  ;;  %v115_v5 = vstv %s209_s14  ;;  %v114_v10 = vmul.f32 %v113_v4, %v72_v0  ;;  %p313_p10 = pnand %p312_p9, %p306_p6 }
  0x3e   :  { %s216_s21 = sld [smem:[#allocation7 + $0x280]]  ;;  %v127_v6 = vstv %s210_s15  ;;  %v116_v11 = vmul.f32 %v115_v5, %v74_v1  ;;  %v104_v19 = vadd.f32 %v103_v8, %v101_v7 }
  0x3f   :  { %s217_s22 = sld [smem:[#allocation7 + $0x281]]  ;;  %v129_v9 = vstv %s211_s16  ;;  %v128_v13 = vmul.f32 %v127_v6, %v72_v0 }
  0x40   :  { %s87_s23 = sld [smem:[#allocation8]]  ;;  %v141_v12 = vstv %s212_s17  ;;  %v130_v14 = vmul.f32 %v129_v9, %v74_v1  ;;  %v117_v22 = vadd.f32 %v116_v11, %v114_v10 }
  0x41   :  { %s218_s24 = sld [smem:[#allocation8 + $0x1]]  ;;  %v143_v15 = vstv %s213_s18  ;;  %v142_v16 = vmul.f32 %v141_v12, %v72_v0 }
  0x42   :  { %s219_s25 = sld [smem:[#allocation8 + $0x2]]  ;;  %v144_v17 = vmul.f32 %v143_v15, %v74_v1  ;;  %v155_v18 = vstv %s214_s19  ;;  %v131_v25 = vadd.f32 %v130_v14, %v128_v13 }
  0x43   :  { %s220_s2 = sld [smem:[#allocation8 + $0x3]]  ;;  %v156_v20 = vmul.f32 %v155_v18, %v72_v0  ;;  %v157_v21 = vstv %s215_s20 }
  0x44   :  { %s221_s26 = sld [smem:[#allocation8 + $0x4]]  ;;  %v158_v23 = vmul.f32 %v157_v21, %v74_v1  ;;  %v169_v24 = vstv %s216_s21  ;;  %v145_v29 = vadd.f32 %v144_v17, %v142_v16 }
  0x45   :  { %s222_s27 = sld [smem:[#allocation8 + $0x5]]  ;;  %v170_v26 = vmul.f32 %v169_v24, %v72_v0  ;;  %v171_v27 = vstv %s217_s22 }
  0x46   :  { %v105_v28 = vstv %s87_s23  ;;  %v172_v30 = vmul.f32 %v171_v27, %v74_v1  ;;  %v159_v33 = vadd.f32 %v158_v23, %v156_v20  ;;  %s93_s28 = sld [smem:[#allocation10]]  ;;  %v183_v20 = vstv %s398_s4 }
  0x47   :  { %v106_v31 = vadd.f32 %v105_v28, %v104_v19  ;;  %v118_v32 = vstv %s218_s24  ;;  %s223_s29 = sld [smem:[#allocation10 + $0x1]] }
  0x48   :  { %v119_v34 = vadd.f32 %v118_v32, %v117_v22  ;;  %v132_v35 = vstv %s219_s25  ;;  %v173_v36 = vadd.f32 %v172_v30, %v170_v26  ;;  %s224_s30 = sld [smem:[#allocation10 + $0x2]] }
  0x49   :  { %v107_v37 = vmul.f32 0.5, %v106_v31  ;;  %v133_v38 = vadd.f32 %v132_v35, %v131_v25  ;;  %v146_v39 = vstv %s220_s2  ;;  %s225_s6 = sld [smem:[#allocation10 + $0x3]] }
  0x4a   :  { %v120_v40 = vmul.f32 0.5, %v119_v34  ;;  %v147_v41 = vadd.f32 %v146_v39, %v145_v29  ;;  %v160_v42 = vstv %s221_s26  ;;  %s382_s7 = sld [smem:[#allocation10 + $0x4]] }
  0x4b   :  { %235 = vtanh.f32 %v107_v37  ;;  %v134_v43 = vmul.f32 0.5, %v133_v38  ;;  %v161_v44 = vadd.f32 %v160_v42, %v159_v33  ;;  %v174_v45 = vstv %s222_s27  ;;  %s384_s8 = sld [smem:[#allocation10 + $0x5]] }
  0x4c   :  { %237 = vtanh.f32 %v120_v40  ;;  %v148_v46 = vmul.f32 0.5, %v147_v41  ;;  %v175_v47 = vadd.f32 %v174_v45, %v173_v36  ;;  %v111_v54 = vstv %s93_s28 }
  0x4d   :  { %239 = vtanh.f32 %v134_v43  ;;  %v162_v48 = vmul.f32 0.5, %v161_v44  ;;  %v124_v58 = vstv %s223_s29 }
  0x4e   :  { %241 = vtanh.f32 %v148_v46  ;;  %v176_v49 = vmul.f32 0.5, %v175_v47  ;;  %v138_v62 = vstv %s224_s30 }
  0x4f   :  { %243 = vtanh.f32 %v162_v48  ;;  %v152_v3 = vstv %s225_s6 }
  0x50   :  { %245 = vtanh.f32 %v176_v49  ;;  %v166_v10 = vstv %s382_s7 }
  0x51   :  { %v180_v14 = vstv %s384_s8 }
  0x58   :  { %v236_v50 = vpop.eup %235 }
  0x59   :  { %v238_v51 = vpop.eup %237  ;;  %v109_v52 = vadd.f32 1.0, %v236_v50 }
  0x5a   :  { %v240_v53 = vpop.eup %239  ;;  %v122_v55 = vadd.f32 1.0, %v238_v51 }
  0x5b   :  { %v242_v56 = vpop.eup %241  ;;  %v110_v57 = vmul.f32 0.5, %v109_v52  ;;  %v136_v59 = vadd.f32 1.0, %v240_v53 }
  0x5c   :  { %v244_v60 = vpop.eup %243  ;;  %v123_v61 = vmul.f32 0.5, %v122_v55  ;;  %v150_v63 = vadd.f32 1.0, %v242_v56 }
  0x5d   :  { %v246_v0 = vpop.eup %245  ;;  %v112_v1 = vmul.f32 %v111_v54, %v110_v57  ;;  %v137_v2 = vmul.f32 0.5, %v136_v59  ;;  %v164_v4 = vadd.f32 1.0, %v244_v60 }
  0x5e   :  { %v125_v5 = vmul.f32 %v124_v58, %v123_v61  ;;  %v151_v6 = vmul.f32 0.5, %v150_v63  ;;  %v178_v7 = vadd.f32 1.0, %v246_v0 }
  0x5f   :  { %v139_v8 = vmul.f32 %v138_v62, %v137_v2  ;;  %v165_v9 = vmul.f32 0.5, %v164_v4 }
  0x60   :  { %v126_v11 = vadd.f32 %v125_v5, %v112_v1  ;;  %v153_v12 = vmul.f32 %v152_v3, %v151_v6  ;;  %v179_v13 = vmul.f32 0.5, %v178_v7 }
  0x61   :  { %v167_v16 = vmul.f32 %v166_v10, %v165_v9 }
  0x62   :  { %v140_v15 = vadd.f32 %v139_v8, %v126_v11  ;;  %v181_v18 = vmul.f32 %v180_v14, %v179_v13 }
  0x64   :  { %v154_v17 = vadd.f32 %v153_v12, %v140_v15 }
  0x66   :  { %v168_v19 = vadd.f32 %v167_v16, %v154_v17 }
  0x68   :  { %v182_v21 = vadd.f32 %v181_v18, %v168_v19 }
  0x6a   :  { %v184_v22 = vadd.f32 %v183_v20, %v182_v21 }
  0x6c   :  { %v185_v23 = vmul.f32 0.5, %v184_v22 }
  0x6e   :  { %247 = vtanh.f32 %v185_v23 }
  0x7b   :  { %v248_v24 = vpop.eup %247 }
  0x7c   :  { %v187_v25 = vadd.f32 1.0, %v248_v24 }
  0x7e   :  { %v188_v26 = vmul.f32 0.5, %v187_v25 }
  0x80   :  { %189 = vst [vmem:[#allocation11] sm:$0xff] %v188_v26 }
  0x81   :  { %316 = shalt.err (!%p313_p10)
}
  0x82   :  { %199 = dma.vmem_to_hbm [thread:$0]  %s197_s0, 128, %s399_s5, [#allocation5]  }
  0x83   :  { %331 = dma.done.wait [#allocation5], 128  }
  0x84   :  { %332 = vsyncadd [#allocation5], 4294967168 }
  0x85   :  { %203 = vsyncpa [#allocation4], 1 }
  0x86   :  { %204 = vsyncpa [#allocation5], 1 }
  0x87   :  { %205 = vsyncpa [#allocation6], 1 }
  0x88   :  { %206 = vsyncpa [#allocation9], 1 }

</bundles_post_ra>
